<compile_context>
chip_gen: v6e
topology: v6e:2x2x1
jax: 0.10.0
libtpu: 0.0.40
codegen_flags: <defaults>
</compile_context>

<pallas_src>
import jax
import jax.numpy as jnp
from jax.experimental import pallas as pl
from jax.experimental.pallas import tpu as pltpu

NEG_SLOPE = 0.01       # nn.LeakyReLU default negative_slope
_MAX_TILE_B = 1024     # batch tile (lanes): 8x1024 f32 input tile = 32 KiB, double-buffered


def _round_up(x, m):
    return ((x + m - 1) // m) * m


def _leaky_relu(x):
    return jnp.where(x >= 0, x, NEG_SLOPE * x)


def _discriminator_kernel(yt_ref, w1_ref, b1_ref, w2_ref, b2_ref, w3_ref, b3_ref,
                          o_ref):
    # Batch on lanes, features on sublanes; weights stored as [out, in].
    # Layer 1: Linear(ydim, hdim) + LeakyReLU
    h = jnp.dot(w1_ref[...], yt_ref[...], preferred_element_type=jnp.float32)
    h = _leaky_relu(h + b1_ref[...])
    # Hidden layer (n_hidden = 1): Linear(hdim, hdim) + LeakyReLU
    h = jnp.dot(w2_ref[...], h, preferred_element_type=jnp.float32)
    h = _leaky_relu(h + b2_ref[...])
    # Output layer: Linear(hdim, 1) + Sigmoid (only sublane row 0 is real)
    o = jnp.dot(w3_ref[...], h, preferred_element_type=jnp.float32)
    o_ref[...] = jax.nn.sigmoid(o + b3_ref[...])


def pad_discriminator_params(params):
    """One-time transpose + pad of weights into kernel layout (hoisted out of forward)."""
    w1, b1, w2, b2, w3, b3 = params      # w*: [in, out], b*: [out]
    ydim, hdim = w1.shape
    Yp = _round_up(ydim, 8)
    Hp = _round_up(hdim, 8)

    def pad2(a, rows, cols):
        a = jnp.asarray(a, jnp.float32)
        return jnp.pad(a, ((0, rows - a.shape[0]), (0, cols - a.shape[1])))

    w1t = pad2(w1.T, Hp, Yp)                 # [Hp, Yp]
    b1c = pad2(b1.reshape(-1, 1), Hp, 1)     # [Hp, 1]
    w2t = pad2(w2.T, Hp, Hp)                 # [Hp, Hp]
    b2c = pad2(b2.reshape(-1, 1), Hp, 1)     # [Hp, 1]
    w3t = pad2(w3.T, 8, Hp)                  # [8, Hp]  (row 0 real)
    b3c = pad2(b3.reshape(-1, 1), 8, 1)      # [8, 1]   (row 0 real)
    return (w1t, b1c, w2t, b2c, w3t, b3c)


@jax.jit
def discriminator_forward(y, padded_params):
    """y: [B, ydim] float32.  Returns [B, 1] float32 sigmoid scores."""
    w1t, b1c, w2t, b2c, w3t, b3c = padded_params
    B, ydim = y.shape
    Hp, Yp = w1t.shape

    tb = min(_MAX_TILE_B, _round_up(B, 128))   # batch tile, multiple of 128 lanes
    Bp = _round_up(B, tb)

    # Batch -> lane axis; zero padding is exact through Linear + LeakyReLU.
    y_t = jnp.pad(y.astype(jnp.float32).T, ((0, Yp - ydim), (0, Bp - B)))

    def batch_block(rows):
        return pl.BlockSpec((rows, tb), lambda i: (0, i))

    def resident(arr):
        return pl.BlockSpec(arr.shape, lambda i: (0, 0))

    out_p = pl.pallas_call(
        _discriminator_kernel,
        out_shape=jax.ShapeDtypeStruct((8, Bp), jnp.float32),
        grid=(Bp // tb,),
        in_specs=[
            batch_block(Yp),
            resident(w1t), resident(b1c),
            resident(w2t), resident(b2c),
            resident(w3t), resident(b3c),
        ],
        out_specs=batch_block(8),
        compiler_params=pltpu.CompilerParams(
            dimension_semantics=("parallel",)),
    )(y_t, w1t, b1c, w2t, b2c, w3t, b3c)

    # Row 0 carries the real logit; padded rows/columns are discarded.
    return out_p[0, :B].reshape(B, 1)


def init_discriminator_params(key, ydim, hdim):
    """Deterministic init matching PyTorch nn.Linear default (uniform ±1/sqrt(fan_in))."""
    ks = jax.random.split(key, 6)

    def lin(kw, kb, fan_in, fan_out):
        bound = 1.0 / jnp.sqrt(jnp.float32(fan_in))
        w = jax.random.uniform(kw, (fan_in, fan_out), jnp.float32, -bound, bound)
        b = jax.random.uniform(kb, (fan_out,), jnp.float32, -bound, bound)
        return w, b

    w1, b1 = lin(ks[0], ks[1], ydim, hdim)
    w2, b2 = lin(ks[2], ks[3], hdim, hdim)   # n_hidden = 1 extra hidden layer
    w3, b3 = lin(ks[4], ks[5], hdim, 1)
    return (w1, b1, w2, b2, w3, b3)


def _reference_forward(y, params):
    w1, b1, w2, b2, w3, b3 = params
    z1 = y @ w1 + b1
    h = jnp.where(z1 >= 0, z1, NEG_SLOPE * z1)
    z2 = h @ w2 + b2
    h = jnp.where(z2 >= 0, z2, NEG_SLOPE * z2)
    return jax.nn.sigmoid(h @ w3 + b3)


if __name__ == "__main__":
    key = jax.random.PRNGKey(0)
    k_param, k_small, k_large = jax.random.split(key, 3)

    # Pinwheel GAN: 2-D samples, small hidden width.
    ydim, hdim, batch = 2, 32, 8
    params = init_discriminator_params(k_param, ydim, hdim)
    padded = pad_discriminator_params(params)   # hoisted: pad/transpose weights once

    y = jax.random.normal(k_small, (batch, ydim), jnp.float32)
    out = jax.block_until_ready(discriminator_forward(y, padded))
    ref = _reference_forward(y, params)
    assert out.shape == (batch, 1), out.shape
    assert jnp.allclose(out, ref, atol=1e-5, rtol=1e-5), (out, ref)

    # Larger, non-multiple batch to exercise the pipelined batch grid (>1 tile).
    big = 2600
    y2 = jax.random.normal(k_large, (big, ydim), jnp.float32)
    out2 = jax.block_until_ready(discriminator_forward(y2, padded))
    ref2 = _reference_forward(y2, params)
    assert out2.shape == (big, 1), out2.shape
    assert jnp.allclose(out2, ref2, atol=1e-5, rtol=1e-5)

    print("KERNEL_OK")
</pallas_src>

<mosaic_0001>
module attributes {stable_mosaic.version = 11 : i64} {
  func.func @_discriminator_kernel(%arg0: i32, %arg1: memref<8x128xf32, #tpu.memory_space<vmem>>, %arg2: memref<32x8xf32, #tpu.memory_space<vmem>>, %arg3: memref<32x1xf32, #tpu.memory_space<vmem>>, %arg4: memref<32x32xf32, #tpu.memory_space<vmem>>, %arg5: memref<32x1xf32, #tpu.memory_space<vmem>>, %arg6: memref<8x32xf32, #tpu.memory_space<vmem>>, %arg7: memref<8x1xf32, #tpu.memory_space<vmem>>, %arg8: memref<8x128xf32, #tpu.memory_space<vmem>>) attributes {dimension_semantics = [#tpu.dimension_semantics<parallel>], iteration_bounds = array<i64: 1>, scalar_prefetch = 0 : i64, scratch_operands = 0 : i64, tpu.core_type = #tpu.core_type<tc>, window_params = [{transform_indices = @transform_0, window_bounds = array<i64: 8, 128>}, {pipeline_mode = #tpu.pipeline_mode<synchronous>, transform_indices = @transform_1, window_bounds = array<i64: 32, 8>}, {pipeline_mode = #tpu.pipeline_mode<synchronous>, transform_indices = @transform_2, window_bounds = array<i64: 32, 1>}, {pipeline_mode = #tpu.pipeline_mode<synchronous>, transform_indices = @transform_3, window_bounds = array<i64: 32, 32>}, {pipeline_mode = #tpu.pipeline_mode<synchronous>, transform_indices = @transform_4, window_bounds = array<i64: 32, 1>}, {pipeline_mode = #tpu.pipeline_mode<synchronous>, transform_indices = @transform_5, window_bounds = array<i64: 8, 32>}, {pipeline_mode = #tpu.pipeline_mode<synchronous>, transform_indices = @transform_6, window_bounds = array<i64: 8, 1>}, {transform_indices = @transform_7, window_bounds = array<i64: 8, 128>}]} {
    %c0 = arith.constant 0 : index
    %c0_0 = arith.constant 0 : index
    %0 = vector.load %arg2[%c0, %c0_0] : memref<32x8xf32, #tpu.memory_space<vmem>>, vector<32x8xf32>
    %c0_1 = arith.constant 0 : index
    %c0_2 = arith.constant 0 : index
    %1 = vector.load %arg1[%c0_1, %c0_2] : memref<8x128xf32, #tpu.memory_space<vmem>>, vector<8x128xf32>
    %cst = arith.constant dense<0.000000e+00> : vector<32x128xf32>
    %2 = tpu.matmul %0, %1, %cst {dimension_numbers = #tpu.dot_dimension_numbers<[1], [0], [0], [1], [0, 0, 1, 1], [], []>} : vector<32x8xf32>, vector<8x128xf32>, vector<32x128xf32> -> vector<32x128xf32>
    %c0_3 = arith.constant 0 : index
    %c0_4 = arith.constant 0 : index
    %3 = vector.load %arg3[%c0_3, %c0_4] : memref<32x1xf32, #tpu.memory_space<vmem>>, vector<32x1xf32>
    %4 = vector.broadcast %3 : vector<32x1xf32> to vector<32x128xf32>
    %5 = arith.addf %2, %4 : vector<32x128xf32>
    %cst_5 = arith.constant 0.000000e+00 : f32
    %6 = vector.broadcast %cst_5 : f32 to vector<32x128xf32>
    %7 = arith.cmpf oge, %5, %6 : vector<32x128xf32>
    %cst_6 = arith.constant 0.00999999977 : f32
    %8 = vector.broadcast %cst_6 : f32 to vector<32x128xf32>
    %9 = arith.mulf %8, %5 : vector<32x128xf32>
    %10 = arith.select %7, %5, %9 : vector<32x128xi1>, vector<32x128xf32>
    %c0_7 = arith.constant 0 : index
    %c0_8 = arith.constant 0 : index
    %11 = vector.load %arg4[%c0_7, %c0_8] : memref<32x32xf32, #tpu.memory_space<vmem>>, vector<32x32xf32>
    %cst_9 = arith.constant dense<0.000000e+00> : vector<32x128xf32>
    %12 = tpu.matmul %11, %10, %cst_9 {dimension_numbers = #tpu.dot_dimension_numbers<[1], [0], [0], [1], [0, 0, 1, 1], [], []>} : vector<32x32xf32>, vector<32x128xf32>, vector<32x128xf32> -> vector<32x128xf32>
    %c0_10 = arith.constant 0 : index
    %c0_11 = arith.constant 0 : index
    %13 = vector.load %arg5[%c0_10, %c0_11] : memref<32x1xf32, #tpu.memory_space<vmem>>, vector<32x1xf32>
    %14 = vector.broadcast %13 : vector<32x1xf32> to vector<32x128xf32>
    %15 = arith.addf %12, %14 : vector<32x128xf32>
    %cst_12 = arith.constant 0.000000e+00 : f32
    %16 = vector.broadcast %cst_12 : f32 to vector<32x128xf32>
    %17 = arith.cmpf oge, %15, %16 : vector<32x128xf32>
    %cst_13 = arith.constant 0.00999999977 : f32
    %18 = vector.broadcast %cst_13 : f32 to vector<32x128xf32>
    %19 = arith.mulf %18, %15 : vector<32x128xf32>
    %20 = arith.select %17, %15, %19 : vector<32x128xi1>, vector<32x128xf32>
    %c0_14 = arith.constant 0 : index
    %c0_15 = arith.constant 0 : index
    %21 = vector.load %arg6[%c0_14, %c0_15] : memref<8x32xf32, #tpu.memory_space<vmem>>, vector<8x32xf32>
    %cst_16 = arith.constant dense<0.000000e+00> : vector<8x128xf32>
    %22 = tpu.matmul %21, %20, %cst_16 {dimension_numbers = #tpu.dot_dimension_numbers<[1], [0], [0], [1], [0, 0, 1, 1], [], []>} : vector<8x32xf32>, vector<32x128xf32>, vector<8x128xf32> -> vector<8x128xf32>
    %c0_17 = arith.constant 0 : index
    %c0_18 = arith.constant 0 : index
    %23 = vector.load %arg7[%c0_17, %c0_18] : memref<8x1xf32, #tpu.memory_space<vmem>>, vector<8x1xf32>
    %24 = vector.broadcast %23 : vector<8x1xf32> to vector<8x128xf32>
    %25 = arith.addf %22, %24 : vector<8x128xf32>
    %26 = arith.negf %25 : vector<8x128xf32>
    %27 = math.exp %26 : vector<8x128xf32>
    %cst_19 = arith.constant 1.000000e+00 : f32
    %28 = vector.broadcast %cst_19 : f32 to vector<8x128xf32>
    %29 = arith.addf %28, %27 : vector<8x128xf32>
    %30 = arith.divf %28, %29 : vector<8x128xf32>
    %c0_20 = arith.constant 0 : index
    %c0_21 = arith.constant 0 : index
    %31 = vector.load %arg8[%c0_20, %c0_21] : memref<8x128xf32, #tpu.memory_space<vmem>>, vector<8x128xf32>
    tpu.vector_store %arg8[%c0_20, %c0_21], %30 {strides = array<i32>} : memref<8x128xf32, #tpu.memory_space<vmem>>, vector<8x128xf32>,
    return
  }
  func.func @transform_0(%arg0: i32) -> (i32, i32) {
    %c0_i32 = arith.constant 0 : i32
    %c0_i32_0 = arith.constant 0 : i32
    return %c0_i32, %arg0 : i32, i32
  }
  func.func @transform_1(%arg0: i32) -> (i32, i32) {
    %c0_i32 = arith.constant 0 : i32
    %c0_i32_0 = arith.constant 0 : i32
    %c0_i32_1 = arith.constant 0 : i32
    return %c0_i32, %c0_i32_0 : i32, i32
  }
  func.func @transform_2(%arg0: i32) -> (i32, i32) {
    %c0_i32 = arith.constant 0 : i32
    %c0_i32_0 = arith.constant 0 : i32
    %c0_i32_1 = arith.constant 0 : i32
    return %c0_i32, %c0_i32_0 : i32, i32
  }
  func.func @transform_3(%arg0: i32) -> (i32, i32) {
    %c0_i32 = arith.constant 0 : i32
    %c0_i32_0 = arith.constant 0 : i32
    %c0_i32_1 = arith.constant 0 : i32
    return %c0_i32, %c0_i32_0 : i32, i32
  }
  func.func @transform_4(%arg0: i32) -> (i32, i32) {
    %c0_i32 = arith.constant 0 : i32
    %c0_i32_0 = arith.constant 0 : i32
    %c0_i32_1 = arith.constant 0 : i32
    return %c0_i32, %c0_i32_0 : i32, i32
  }
  func.func @transform_5(%arg0: i32) -> (i32, i32) {
    %c0_i32 = arith.constant 0 : i32
    %c0_i32_0 = arith.constant 0 : i32
    %c0_i32_1 = arith.constant 0 : i32
    return %c0_i32, %c0_i32_0 : i32, i32
  }
  func.func @transform_6(%arg0: i32) -> (i32, i32) {
    %c0_i32 = arith.constant 0 : i32
    %c0_i32_0 = arith.constant 0 : i32
    %c0_i32_1 = arith.constant 0 : i32
    return %c0_i32, %c0_i32_0 : i32, i32
  }
  func.func @transform_7(%arg0: i32) -> (i32, i32) {
    %c0_i32 = arith.constant 0 : i32
    %c0_i32_0 = arith.constant 0 : i32
    return %c0_i32, %arg0 : i32, i32
  }
}

</mosaic_0001>

<bundles_post_ra>
// kernel: discriminator_forward.1
= control target key start
LH: loop header
LB: loop body
LE: loop exit
PB: predicated region body
PF: predicated region fallthrough
CT: control target
= control target key end

     0   :  { %vm55_vm0 = vcmask 64512   ;;  %v464_v3 = vmov 0   ;;  %vm193_vm1 = vcmask 261120   ;;  %v465_v39 = vmov 0.0   ;;  %s576_s0 = inlined_call_operand.vmem [shape: f32[8,128], index: 0, kind: input, shape index: {}]   ;;  %s577_s1 = inlined_call_operand.vmem [shape: f32[32,8], index: 1, kind: input, shape index: {}]   ;;  %s578_s2 = inlined_call_operand.vmem [shape: f32[32,1], index: 2, kind: input, shape index: {}]   ;;  %s579_s4 = inlined_call_operand.vmem [shape: f32[32,1], index: 4, kind: input, shape index: {}]   ;;  %s580_s6 = inlined_call_operand.vmem [shape: f32[8,1], index: 6, kind: input, shape index: {}]   ;;  %s581_s3 = inlined_call_operand.vmem [shape: f32[32,32], index: 3, kind: input, shape index: {}]   ;;  %s582_s5 = inlined_call_operand.vmem [shape: f32[8,32], index: 5, kind: input, shape index: {}]   ;;  %s583_s7 = inlined_call_operand.vmem [shape: f32[8,128], index: 7, kind: output, shape index: {}]  }
   0x1   :  { %v30_v0 = vld [vmem:[%s576_s0] sm:$0xff]  ;;  %v27_v2 = vld [vmem:[%s577_s1 + $0x8] sm:$0xff]  ;;  %458 = vset.pattern.permute.xlu0 %v464_v3  ;;  %459 = vset.pattern.permute.xlu1 %v464_v3  ;;  %v28_v4 = vld [vmem:[%s577_s1 + $0x10] sm:$0xff]  ;;  %vm466_vm6 = vmmov 0  }
   0x2   :  { %v26_v1 = vld [vmem:[%s577_s1] sm:$0xff]  ;;  %422 = vmatprep.subr.mxu0 %v30_v0  ;;  %v34_v5 = vld [vmem:[%s578_s2 + $0x18] sm:$0xff]  ;;  %v32_v6 = vld [vmem:[%s578_s2 + $0x8] sm:$0xff] }
   0x3   :  { %424 = vmatprep.mubr.msk.f32.mxu0 %vm55_vm0, %v26_v1  ;;  %423 = vmatpush3.msra.mxu0 %v30_v0  ;;  %v33_v7 = vld [vmem:[%s578_s2 + $0x10] sm:$0xff]  ;;  %v29_v8 = vld [vmem:[%s577_s1 + $0x18] sm:$0xff]  ;;  %v31_v9 = vld [vmem:[%s578_s2] sm:$0xff] }
   0x4   :  { %52 = vperm.xlu0 %458, %v34_v5   ;;  %425 = vmatmul.mubr.msk.f32.vlgmr.msra.gmra.mxu0 %vm55_vm0, %v27_v2  ;;  %v172_v10 = vld [vmem:[%s579_s4 + $0x18] sm:$0xff]  ;;  %v171_v11 = vld [vmem:[%s579_s4 + $0x10] sm:$0xff]  ;;  %v170_v12 = vld [vmem:[%s579_s4 + $0x8] sm:$0xff] }
   0x5   :  { %42 = vperm.xlu1 %459, %v32_v6   ;;  %427 = vmatprep.mubr.msk.f32.mxu0 %vm55_vm0, %v28_v4  ;;  %v169_v13 = vld [vmem:[%s579_s4] sm:$0xff]  ;;  %v166_v36 = vld [vmem:[%s581_s3 + $0x8] sm:$0xff]  ;;  %v167_v37 = vld [vmem:[%s581_s3 + $0x10] sm:$0xff] }
   0x6   :  { %v304_v14 = vld [vmem:[%s580_s6] sm:$0xff]  ;;  %v168_v38 = vld [vmem:[%s581_s3 + $0x18] sm:$0xff]  ;;  %444 = vmatprep.subr.mxu0 %v465_v39 }
   0x7   :  { %v165_v15 = vld [vmem:[%s581_s3] sm:$0xff] }
   0x8   :  { %47 = vperm.xlu0 %458, %v33_v7   ;;  %428 = vmatmul.mubr.msk.f32.gmra.mxu0 %vm55_vm0, %v29_v8  ;;  %v303_v59 = vld [vmem:[%s582_s5] sm:$0xff] }
   0x9   :  { %37 = vperm.xlu1 %459, %v31_v9   ;;  %438 = vmatprep.mubr.msk.f32.mxu1 %vm193_vm1, %v165_v15 }
   0xa   :  { %452 = vmatprep.mubr.msk.f32.mxu0 %vm466_vm6, %v465_v39 }
   0xc   :  { %190 = vperm.xlu0 %458, %v172_v10  }
   0xd   :  { %185 = vperm.xlu1 %459, %v171_v11  }
  0x10   :  { %180 = vperm.xlu0 %458, %v170_v12  }
  0x11   :  { %175 = vperm.xlu1 %459, %v169_v13  }
  0x14   :  { %307 = vperm.xlu0 %458, %v304_v14  }
  0x7f   :  { %v53_v16 = vpop.permute.xlu0 %52 }
  0x80   :  { %v43_v17 = vpop.permute.xlu1 %42 }
  0x83   :  { %v48_v21 = vpop.permute.xlu0 %47 }
  0x84   :  { %v38_v24 = vpop.permute.xlu1 %37 }
  0x87   :  { %v191_v40 = vpop.permute.xlu0 %190 }
  0x88   :  { %v186_v41 = vpop.permute.xlu1 %185 }
  0x8b   :  { %v181_v44 = vpop.permute.xlu0 %180 }
  0x8c   :  { %v176_v48 = vpop.permute.xlu1 %175 }
  0x8f   :  { %v308_v61 = vpop.permute.xlu0 %307 }
  0xc4   :  { %v426_v18 = vpop.f32.mrf.mxu0 }
  0xc5   :  { %v140_v22 = vadd.f32 %v426_v18, %v43_v17 }
  0xc6   :  { %v134_v19 = vpop.f32.mrf.mxu0 }
  0xc7   :  { %v135_v26 = vadd.f32 %v134_v19, %v38_v24  ;;  %v158_v29 = vmul.f32 0.01, %v140_v22  ;;  %vm154_vm4 = vcmp.ge.f32.partialorder %v140_v22, 0.0 }
  0xc8   :  { %v429_v20 = vpop.f32.mrf.mxu0 }
  0xc9   :  { %v150_v23 = vadd.f32 %v429_v20, %v53_v16  ;;  %v157_v32 = vmul.f32 0.01, %v135_v26  ;;  %vm153_vm5 = vcmp.ge.f32.partialorder %v135_v26, 0.0  ;;  %v162_v34 = vsel %vm154_vm4, %v140_v22, %v158_v29 }
  0xca   :  { %v144_v25 = vpop.f32.mrf.mxu0 }
  0xcb   :  { %v145_v27 = vadd.f32 %v144_v25, %v48_v21  ;;  %vm156_vm2 = vcmp.ge.f32.partialorder %v150_v23, 0.0  ;;  %v160_v28 = vmul.f32 0.01, %v150_v23  ;;  %v161_v35 = vsel %vm153_vm5, %v135_v26, %v157_v32 }
  0xcd   :  { %v159_v30 = vmul.f32 0.01, %v145_v27  ;;  %v164_v31 = vsel %vm156_vm2, %v150_v23, %v160_v28  ;;  %vm155_vm3 = vcmp.ge.f32.partialorder %v145_v27, 0.0 }
  0xce   :  { %430 = vmatprep.subr.mxu1 %v164_v31 }
  0xcf   :  { %431 = vmatpush3.msra.mxu1 %v164_v31  ;;  %v163_v33 = vsel %vm155_vm3, %v145_v27, %v159_v30 }
  0xd0   :  { %432 = vmatprep.subr.mxu1 %v163_v33 }
  0xd1   :  { %433 = vmatpush3.msra.mxu1 %v163_v33 }
  0xd2   :  { %434 = vmatprep.subr.mxu1 %v162_v34 }
  0xd3   :  { %435 = vmatpush3.msra.mxu1 %v162_v34 }
  0xd4   :  { %436 = vmatprep.subr.mxu1 %v161_v35 }
  0xd5   :  { %437 = vmatpush3.msra.mxu1 %v161_v35 }
  0xd6   :  { %439 = vmatmul.mubr.msk.f32.vlgmr.msra.gmra.mxu1 %vm193_vm1, %v166_v36 }
  0xd7   :  { %441 = vmatprep.mubr.msk.f32.mxu1 %vm193_vm1, %v167_v37 }
  0xda   :  { %442 = vmatmul.mubr.msk.f32.gmra.mxu1 %vm193_vm1, %v168_v38 }
 0x196   :  { %v440_v42 = vpop.f32.mrf.mxu1 }
 0x197   :  { %v278_v46 = vadd.f32 %v440_v42, %v181_v44 }
 0x198   :  { %v272_v43 = vpop.f32.mrf.mxu1 }
 0x199   :  { %v273_v50 = vadd.f32 %v272_v43, %v176_v48  ;;  %v296_v53 = vmul.f32 0.01, %v278_v46  ;;  %vm292_vm9 = vcmp.ge.f32.partialorder %v278_v46, 0.0 }
 0x19a   :  { %v443_v45 = vpop.f32.mrf.mxu1 }
 0x19b   :  { %v288_v47 = vadd.f32 %v443_v45, %v191_v40  ;;  %v295_v56 = vmul.f32 0.01, %v273_v50  ;;  %vm291_vm10 = vcmp.ge.f32.partialorder %v273_v50, 0.0  ;;  %v300_v58 = vsel %vm292_vm9, %v278_v46, %v296_v53 }
 0x19c   :  { %v282_v49 = vpop.f32.mrf.mxu1 }
 0x19d   :  { %vm294_vm7 = vcmp.ge.f32.partialorder %v288_v47, 0.0  ;;  %v298_v51 = vmul.f32 0.01, %v288_v47  ;;  %v283_v52 = vadd.f32 %v282_v49, %v186_v41  ;;  %v299_v60 = vsel %vm291_vm10, %v273_v50, %v295_v56 }
 0x19f   :  { %vm293_vm8 = vcmp.ge.f32.partialorder %v283_v52, 0.0  ;;  %v297_v54 = vmul.f32 0.01, %v283_v52  ;;  %v302_v55 = vsel %vm294_vm7, %v288_v47, %v298_v51 }
 0x1a0   :  { %445 = vmatpush3.msra.mxu0 %v302_v55 }
 0x1a1   :  { %446 = vmatprep.subr.mxu0 %v465_v39  ;;  %v301_v57 = vsel %vm293_vm8, %v283_v52, %v297_v54 }
 0x1a2   :  { %447 = vmatpush3.msra.mxu0 %v301_v57 }
 0x1a3   :  { %448 = vmatprep.subr.mxu0 %v465_v39 }
 0x1a4   :  { %449 = vmatpush3.msra.mxu0 %v300_v58 }
 0x1a5   :  { %450 = vmatprep.subr.mxu0 %v465_v39 }
 0x1a6   :  { %451 = vmatpush3.msra.mxu0 %v299_v60 }
 0x1a7   :  { %453 = vmatmul.mubr.msk.f32.vlgmr.msra.gmra.mxu0 %vm193_vm1, %v303_v59 }
 0x267   :  { %v379_v62 = vpop.f32.mrf.mxu0 }
 0x268   :  { %v380_v63 = vadd.f32 %v379_v62, %v308_v61 }
 0x269   :  { %v454_v0 = vpop.f32.mrf.mxu0 }
 0x26a   :  { %v403_v1 = vmul.f32 -1.442695, %v380_v63 }
 0x26c   :  { %460 = vpow2.f32 %v403_v1 }
 0x279   :  { %v461_v2 = vpop.eup %460 }
 0x27a   :  { %v386_v3 = vadd.f32 1.0, %v461_v2 }
 0x27c   :  { %462 = vrcp.f32 %v386_v3 }
 0x289   :  { %v463_v4 = vpop.eup %462 }
 0x28a   :  { %389 = vst [vmem:[%s583_s7] sm:$0xff] %v463_v4 }

</bundles_post_ra>
